<compile_context>
chip_gen: v7x
topology: tpu7x:2x2x1
jax: 0.10.0
libtpu: 0.0.40
codegen_flags: <defaults>
</compile_context>

<pallas_src>
import math
from functools import lru_cache

import numpy as np
import jax
import jax.numpy as jnp
from jax.experimental import pallas as pl
from jax.experimental.pallas import tpu as pltpu

NUM_EXPERTS = 4
BN_EPS = 1e-5

# +1 if pltpu.roll follows jnp.roll semantics (roll(x, s)[i] == x[i - s]),
# -1 otherwise.  Determined once on real hardware before any kernel is traced;
# all shift amounts are Python ints baked in at trace time.
_ROLL_SIGN = 1


def _detect_roll_sign():
  global _ROLL_SIGN

  def kern(x_ref, o_ref):
    o_ref[...] = pltpu.roll(x_ref[...], 1, 1)

  x = jnp.tile(jnp.arange(128, dtype=jnp.float32)[None, :], (8, 1))
  y = pl.pallas_call(
      kern, out_shape=jax.ShapeDtypeStruct((8, 128), jnp.float32))(x)
  _ROLL_SIGN = 1 if float(y[0, 0]) == 127.0 else -1


# --------------------------- in-kernel conv core -----------------------------
def _lane_shift(v, off, hw):
  """shifted[i] = v[i + off] (wrap-around lanes are zeroed by caller masks)."""
  if off == 0:
    return v
  return pltpu.roll(v, (_ROLL_SIGN * (-off)) % hw, 1)


def _im2col(x, masks, W, ksize, pad):
  """x: (Cin, HW) f32 -> (k*k*Cin, HW) f32 patch stack, tap order (kh, kw).

  masks: (2k, HW) f32 {0,1}; rows [0:k] = row validity for dy=kh-pad,
  rows [k:2k] = column validity for dx=kw-pad.  Row shifts are computed once
  per dy and the dx=+-1 variants derive from them with +-1-lane rolls.
  """
  hw = x.shape[-1]
  taps = []
  for kh in range(ksize):
    dy = kh - pad
    row = _lane_shift(x, dy * W, hw)
    if dy != 0:
      row = row * masks[kh:kh + 1]
    for kw in range(ksize):
      dx = kw - pad
      tap = _lane_shift(row, dx, hw)
      if dx != 0:
        tap = tap * masks[ksize + kw:ksize + kw + 1]
      taps.append(tap)
  return jnp.concatenate(taps, axis=0)


def _sigmoid(z):
  return 1.0 / (1.0 + jnp.exp(-z))


def _routing(route_w, route_b, x_f32):
  """sigmoid(Rw @ mean_hw(x) + b), computed as mean over lanes of (Rw @ x)."""
  hw = x_f32.shape[-1]
  logits = jnp.sum(
      jnp.dot(route_w, x_f32, preferred_element_type=jnp.float32),
      axis=1, keepdims=True) * (1.0 / hw) + route_b
  return _sigmoid(logits)                                   # (E, 1) f32


def _mix_experts(bank, r):
  """bank (E, Cout, KC) f32, r (E, 1) f32 -> per-sample weight (Cout, KC) bf16."""
  w = bank[0] * r[0:1, 0:1]
  for e in range(1, NUM_EXPERTS):
    w = w + bank[e] * r[e:e + 1, 0:1]
  return w.astype(jnp.bfloat16)


def _make_condconv_kernel(W, ksize, pad, relu):
  """CondConv (in-kernel routing + expert mix) + folded-BN shift [+ ReLU]."""

  def kernel(*refs):
    if ksize > 1:
      x_ref, bank_ref, rw_ref, rb_ref, m_ref, t_ref, o_ref = refs
    else:
      x_ref, bank_ref, rw_ref, rb_ref, t_ref, o_ref = refs
    x_bf = x_ref[0]                                  # (Cin, HW) bf16
    x_f = x_bf.astype(jnp.float32)
    r = _routing(rw_ref[...], rb_ref[...], x_f)
    wmix = _mix_experts(bank_ref[...], r)            # (Cout, kk*Cin) bf16
    if ksize > 1:
      xcol = _im2col(x_f, m_ref[...], W, ksize, pad).astype(jnp.bfloat16)
    else:
      xcol = x_bf
    y = jnp.dot(wmix, xcol, preferred_element_type=jnp.float32)  # (Cout, HW)
    y = y + t_ref[...]                               # BN shift (zeros if no BN)
    if relu:
      y = jnp.maximum(y, 0.0)
    o_ref[0] = y.astype(o_ref.dtype)

  return kernel


def _make_resblock_kernel(W, ksize, pad):
  """Fused ResidualBlock: conv1(BN1 scale folded)+shift+ReLU -> in-kernel
  routing/mix for conv2 -> conv2 -> +og_x -> BN2 -> ReLU.  One sample/step."""

  def kernel(x_ref, m_ref, b1_ref, rw1_ref, rb1_ref, t1_ref,
             b2_ref, rw2_ref, rb2_ref, s2_ref, t2_ref, o_ref):
    x_bf = x_ref[0]                                  # (C, HW) bf16
    x_f = x_bf.astype(jnp.float32)
    masks = m_ref[...]

    # conv1 -> BN1 -> ReLU (BN1 scale pre-folded into b1)
    r1 = _routing(rw1_ref[...], rb1_ref[...], x_f)
    w1 = _mix_experts(b1_ref[...], r1)
    xcol = _im2col(x_f, masks, W, ksize, pad).astype(jnp.bfloat16)
    h = jnp.dot(w1, xcol, preferred_element_type=jnp.float32)
    h = jnp.maximum(h + t1_ref[...], 0.0)            # (C, HW) f32

    # conv2 (routing depends on h, which only lives in VMEM)
    r2 = _routing(rw2_ref[...], rb2_ref[...], h)
    w2 = _mix_experts(b2_ref[...], r2)
    hcol = _im2col(h, masks, W, ksize, pad).astype(jnp.bfloat16)
    y = jnp.dot(w2, hcol, preferred_element_type=jnp.float32)

    # residual -> BN2 -> ReLU
    y = y + x_f
    y = jnp.maximum(y * s2_ref[...] + t2_ref[...], 0.0)
    o_ref[0] = y.astype(o_ref.dtype)

  return kernel


# --------------------------- JAX glue ----------------------------------------
def _bn_affine(bn, c):
  if bn is None:
    return jnp.ones((c, 1), jnp.float32), jnp.zeros((c, 1), jnp.float32)
  s = bn["gamma"] / jnp.sqrt(bn["var"] + BN_EPS)
  return s.reshape(c, 1), (bn["beta"] - bn["mean"] * s).reshape(c, 1)


@lru_cache(maxsize=None)
def _shift_masks_np(H, W, k, pad):
  """(2k, H*W) f32 {0,1}: rows [0:k] row validity, rows [k:2k] column validity."""
  hw = H * W
  row = np.arange(hw) // W
  col = np.arange(hw) % W
  m = np.ones((2 * k, hw), np.float32)
  for kh in range(k):
    dy = kh - pad
    m[kh] = ((row + dy >= 0) & (row + dy < H)).astype(np.float32)
  for kw in range(k):
    dx = kw - pad
    m[k + kw] = ((col + dx >= 0) & (col + dx < W)).astype(np.float32)
  return m


def _prep_bank(p, cin_pad, scale=None):
  """Expert bank -> (E, Cout, k*k*cin_pad) f32 with column order (kh, kw, cin);
  optional per-output-channel BN scale folded in f32 before the bf16 cast."""
  cin, cout, k = p["in_channels"], p["out_channels"], p["kernel_size"]
  bank = p["experts"].reshape(NUM_EXPERTS, cout, cin, k, k)
  if cin_pad > cin:
    bank = jnp.pad(bank, ((0, 0), (0, 0), (0, cin_pad - cin), (0, 0), (0, 0)))
  bank = jnp.transpose(bank, (0, 1, 3, 4, 2)).reshape(
      NUM_EXPERTS, cout, k * k * cin_pad)
  if scale is not None:
    bank = bank * scale.reshape(1, cout, 1)
  return bank


def condconv_forward(x, p, H, W, relu=False, bn=None):
  """CondConv2d (+ optional folded BN / ReLU).  x: (B, Cin, H*W) bf16 -> bf16."""
  B, cin, HW = x.shape
  cout, k, pad = p["out_channels"], p["kernel_size"], p["padding"]
  assert pad == (k - 1) // 2, "encoder only uses stride-1 'same' convs"
  kk = k * k

  # Pad Cin up to a multiple of 8 so every im2col tap is sublane-tile aligned.
  cin_p = -(-cin // 8) * 8
  rw = p["route_w"]
  if cin_p != cin:
    x = jnp.concatenate([x, jnp.zeros((B, cin_p - cin, HW), x.dtype)], axis=1)
    rw = jnp.pad(rw, ((0, 0), (0, cin_p - cin)))
  rb = p["route_b"].reshape(NUM_EXPERTS, 1)

  scale, shift = None, jnp.zeros((cout, 1), jnp.float32)
  if bn is not None:
    scale, shift = _bn_affine(bn, cout)
  bank = _prep_bank(p, cin_p, scale)

  args = [x, bank, rw, rb]
  in_specs = [
      pl.BlockSpec((1, cin_p, HW), lambda b: (b, 0, 0)),
      pl.BlockSpec((NUM_EXPERTS, cout, kk * cin_p), lambda b: (0, 0, 0)),
      pl.BlockSpec((NUM_EXPERTS, cin_p), lambda b: (0, 0)),
      pl.BlockSpec((NUM_EXPERTS, 1), lambda b: (0, 0)),
  ]
  if k > 1:
    args.append(jnp.asarray(_shift_masks_np(H, W, k, pad)))
    in_specs.append(pl.BlockSpec((2 * k, HW), lambda b: (0, 0)))
  args.append(shift)
  in_specs.append(pl.BlockSpec((cout, 1), lambda b: (0, 0)))

  return pl.pallas_call(
      _make_condconv_kernel(W, k, pad, relu),
      out_shape=jax.ShapeDtypeStruct((B, cout, HW), jnp.bfloat16),
      grid_spec=pltpu.PrefetchScalarGridSpec(
          num_scalar_prefetch=0,
          grid=(B,),
          in_specs=in_specs,
          out_specs=pl.BlockSpec((1, cout, HW), lambda b: (b, 0, 0)),
      ),
      compiler_params=pltpu.CompilerParams(dimension_semantics=("parallel",)),
  )(*args)


def resblock_forward(x, p, H, W):
  """Fused ResidualBlock.  x: (B, C, H*W) bf16 -> same shape (bf16)."""
  B, C, HW = x.shape
  # TODO(synk): pad channels if a config ever uses C % 8 != 0.
  assert C % 8 == 0, "resblock channels assumed sublane-tile aligned"
  k, pad = p["conv1"]["kernel_size"], p["conv1"]["padding"]
  assert pad == (k - 1) // 2, "encoder only uses stride-1 'same' convs"
  kk = k * k

  s1, t1 = _bn_affine(p["bn1"], C)
  s2, t2 = _bn_affine(p["bn2"], C)
  b1 = _prep_bank(p["conv1"], C, s1)          # BN1 scale folded into conv1 bank
  b2 = _prep_bank(p["conv2"], C)              # BN2 applies after the residual
  masks = jnp.asarray(_shift_masks_np(H, W, k, pad))
  rb1 = p["conv1"]["route_b"].reshape(NUM_EXPERTS, 1)
  rb2 = p["conv2"]["route_b"].reshape(NUM_EXPERTS, 1)

  return pl.pallas_call(
      _make_resblock_kernel(W, k, pad),
      out_shape=jax.ShapeDtypeStruct((B, C, HW), jnp.bfloat16),
      grid_spec=pltpu.PrefetchScalarGridSpec(
          num_scalar_prefetch=0,
          grid=(B,),
          in_specs=[
              pl.BlockSpec((1, C, HW), lambda b: (b, 0, 0)),               # og_x
              pl.BlockSpec((2 * k, HW), lambda b: (0, 0)),                 # masks
              pl.BlockSpec((NUM_EXPERTS, C, kk * C), lambda b: (0, 0, 0)),  # bank1
              pl.BlockSpec((NUM_EXPERTS, C), lambda b: (0, 0)),            # route_w1
              pl.BlockSpec((NUM_EXPERTS, 1), lambda b: (0, 0)),            # route_b1
              pl.BlockSpec((C, 1), lambda b: (0, 0)),                      # bn1 shift
              pl.BlockSpec((NUM_EXPERTS, C, kk * C), lambda b: (0, 0, 0)),  # bank2
              pl.BlockSpec((NUM_EXPERTS, C), lambda b: (0, 0)),            # route_w2
              pl.BlockSpec((NUM_EXPERTS, 1), lambda b: (0, 0)),            # route_b2
              pl.BlockSpec((C, 1), lambda b: (0, 0)),                      # bn2 scale
              pl.BlockSpec((C, 1), lambda b: (0, 0)),                      # bn2 shift
          ],
          out_specs=pl.BlockSpec((1, C, HW), lambda b: (b, 0, 0)),
      ),
      compiler_params=pltpu.CompilerParams(dimension_semantics=("parallel",)),
  )(x, masks, b1, p["conv1"]["route_w"], rb1, t1,
    b2, p["conv2"]["route_w"], rb2, s2, t2)


def maxpool2x2_flat(x, H, W):
  # TODO(synk): fuse the 2x2 max-pool into the downsample CondConv kernel so the
  # pre-pool activation only crosses HBM once per stage.
  B, C, _ = x.shape
  return x.reshape(B, C, H // 2, 2, W // 2, 2).max(axis=(3, 5)).reshape(B, C, -1)


def encoder_forward(x_nchw, stages):
  """x_nchw: (B, Cin, H, W) f32.  Returns (out, skips) in NCHW f32 like the module."""
  B, C0, H, W = x_nchw.shape
  # Channel-major flat activations; bf16 end-to-end in HBM between kernels.
  x = x_nchw.reshape(B, C0, H * W).astype(jnp.bfloat16)
  skips = []
  for st in stages:
    if st["kind"] == "first":
      x = condconv_forward(x, st["conv"], H, W)                  # no BN / ReLU
    else:
      x = maxpool2x2_flat(x, H, W)
      H, W = H // 2, W // 2
      x = condconv_forward(x, st["conv"], H, W, relu=True, bn=st["bn"])
    for bp in st["blocks"]:
      x = resblock_forward(x, bp, H, W)
    skips.append(x.reshape(B, -1, H, W).astype(jnp.float32))
  return skips[-1], skips


# --------------------------- Deterministic init ------------------------------
def init_condconv(key, cin, cout, ksize, padding):
  k1, k2, k3 = jax.random.split(key, 3)
  fan_in = cin * ksize * ksize
  b = 1.0 / math.sqrt(fan_in)
  rb = 1.0 / math.sqrt(cin)
  return dict(
      experts=jax.random.uniform(k1, (NUM_EXPERTS, cout * cin * ksize * ksize),
                                 jnp.float32, -b, b),
      route_w=jax.random.uniform(k2, (NUM_EXPERTS, cin), jnp.float32, -rb, rb),
      route_b=jax.random.uniform(k3, (NUM_EXPERTS,), jnp.float32, -rb, rb),
      in_channels=cin, out_channels=cout, kernel_size=ksize, padding=padding,
  )


def init_bn(key, c):
  k1, k2, k3, k4 = jax.random.split(key, 4)
  return dict(
      gamma=jax.random.uniform(k1, (c,), jnp.float32, 0.5, 1.5),
      beta=0.1 * jax.random.normal(k2, (c,), jnp.float32),
      mean=0.1 * jax.random.normal(k3, (c,), jnp.float32),
      var=jax.random.uniform(k4, (c,), jnp.float32, 0.5, 1.5),
  )


def init_resblock(key, nf, ksize, padding):
  k1, k2, k3, k4 = jax.random.split(key, 4)
  return dict(conv1=init_condconv(k1, nf, nf, ksize, padding),
              bn1=init_bn(k2, nf),
              conv2=init_condconv(k3, nf, nf, ksize, padding),
              bn2=init_bn(k4, nf))


def init_encoder(key, n_in, hidden, ksize, padding, n_res):
  keys = iter(jax.random.split(key, 128))
  stages = [dict(
      kind="first",
      conv=init_condconv(next(keys), n_in, hidden[0], ksize, padding),
      blocks=[init_resblock(next(keys), hidden[0], ksize, padding)
              for _ in range(n_res)])]
  for fin, fout in zip(hidden[:-1], hidden[1:]):
    stages.append(dict(
        kind="down",
        conv=init_condconv(next(keys), fin, fout, 1, 0),
        bn=init_bn(next(keys), fout),
        blocks=[init_resblock(next(keys), fout, ksize, padding)
                for _ in range(n_res)]))
  return stages


# --------------------------- Pure-JAX reference ------------------------------
def _maxpool_nchw(x):
  B, C, H, W = x.shape
  return x.reshape(B, C, H // 2, 2, W // 2, 2).max(axis=(3, 5))


def _ref_condconv(x, p, relu=False, bn=None, residual=None):
  B, C, H, W = x.shape
  k, pad, cout = p["kernel_size"], p["padding"], p["out_channels"]
  pooled = x.mean(axis=(2, 3))
  routing = jax.nn.sigmoid(pooled @ p["route_w"].T + p["route_b"])
  w = (routing @ p["experts"]).reshape(B, cout, C, k, k)
  outs = [jax.lax.conv_general_dilated(
              x[b:b + 1], w[b], (1, 1), [(pad, pad), (pad, pad)],
              dimension_numbers=("NCHW", "OIHW", "NCHW"),
              precision=jax.lax.Precision.HIGHEST)
          for b in range(B)]
  out = jnp.concatenate(outs, axis=0)
  if residual is not None:
    out = out + residual
  if bn is not None:
    s = bn["gamma"] / jnp.sqrt(bn["var"] + BN_EPS)
    out = out * s[None, :, None, None] + (bn["beta"] - bn["mean"] * s)[None, :, None, None]
  if relu:
    out = jnp.maximum(out, 0.0)
  return out


def _ref_resblock(x, p):
  h = _ref_condconv(x, p["conv1"], relu=True, bn=p["bn1"])
  return _ref_condconv(h, p["conv2"], relu=True, bn=p["bn2"], residual=x)


def _ref_encoder(x, stages):
  skips = []
  for st in stages:
    if st["kind"] == "first":
      x = _ref_condconv(x, st["conv"])
    else:
      x = _maxpool_nchw(x)
      x = _ref_condconv(x, st["conv"], relu=True, bn=st["bn"])
    for bp in st["blocks"]:
      x = _ref_resblock(x, bp)
    skips.append(x)
  return x, skips


# ------------------------------- main ----------------------------------------
if __name__ == "__main__":
  _detect_roll_sign()   # one tiny eager pallas_call; bakes the lane-shift sign

  key = jax.random.PRNGKey(0)
  kp, kx = jax.random.split(key)

  n_features_input = 4
  num_hidden_features = [8, 16]
  kernel_size, padding, n_resblocks = 3, 1, 1

  params = init_encoder(kp, n_features_input, num_hidden_features,
                        kernel_size, padding, n_resblocks)
  # 32x32 input: per-stage H*W is 1024 / 256, a multiple of the 128-lane width
  # at every stage (lane-dense stores + aligned lane rotations).
  x = jax.random.normal(kx, (2, n_features_input, 32, 32), jnp.float32)

  fwd = jax.jit(lambda inp: encoder_forward(inp, params))
  out, skips = fwd(x)
  jax.block_until_ready(out)
  jax.block_until_ready(skips)

  # Sanity check against a pure-JAX reference (lax.conv, f32).  Tolerance is
  # loose enough for bf16 MXU operands + bf16 inter-layer activations
  # (accumulation and epilogue math stay f32); every stage output is compared.
  ref_out, ref_skips = _ref_encoder(x, params)
  worst = 0.0
  for a, b in zip([out] + list(skips), [ref_out] + list(ref_skips)):
    assert a.shape == b.shape, (a.shape, b.shape)
    rel = float(jnp.max(jnp.abs(a - b)) / (jnp.max(jnp.abs(b)) + 1e-6))
    worst = max(worst, rel)
  assert worst < 5e-2, f"mismatch vs reference: rel err {worst}"

  print("KERNEL_OK")
</pallas_src>

<mosaic_0001>
module attributes {stable_mosaic.version = 11 : i64} {
  func.func @kern(%arg0: memref<8x128xf32, #tpu.memory_space<vmem>>, %arg1: memref<8x128xf32, #tpu.memory_space<vmem>>) attributes {dimension_semantics = [], scalar_prefetch = 0 : i64, scratch_operands = 0 : i64, tpu.core_type = #tpu.core_type<tc>} {
    %c0 = arith.constant 0 : index
    %c0_0 = arith.constant 0 : index
    %0 = vector.load %arg0[%c0, %c0_0] : memref<8x128xf32, #tpu.memory_space<vmem>>, vector<8x128xf32>
    %c1_i32 = arith.constant 1 : i32
    %1 = tpu.dynamic_rotate %0 by %c1_i32 dim 1 : vector<8x128xf32>, i32 -> vector<8x128xf32>
    %c0_1 = arith.constant 0 : index
    %c0_2 = arith.constant 0 : index
    %2 = vector.load %arg1[%c0_1, %c0_2] : memref<8x128xf32, #tpu.memory_space<vmem>>, vector<8x128xf32>
    tpu.vector_store %arg1[%c0_1, %c0_2], %1 {strides = array<i32>} : memref<8x128xf32, #tpu.memory_space<vmem>>, vector<8x128xf32>,
    return
  }
}

</mosaic_0001>

<bundles_post_ra>
// kernel: tpu_custom_call.1
= control target key start
LH: loop header
LB: loop body
LE: loop exit
PB: predicated region body
PF: predicated region fallthrough
CT: control target
= control target key end

     0   :  { %6 = vsyncpa [#allocation3], 0  ;;  %s128_s0 = inlined_call_operand.hbm [shape: f32[8,128], index: 0, kind: input, shape index: {}]   ;;  %s129_s1 = inlined_call_operand.hbm [shape: f32[8,128], index: 1, kind: output, shape index: {}]  }
   0x1   :  { %7 = vsyncpa [#allocation4], 0  ;;  %s91_s6 = smov [#allocation2]   ;;  %s43_s10 = scalar_lea.hbm %s128_s0, 128 }
   0x2   :  { %s14_s7 = sshll.u32 %s91_s6, 4  ;;  %p44_p0 = scmp.ne.s32.totalorder %s128_s0, %s43_s10  ;;  %s15_s7 = int_to_ptr.vmem [resolvable:$true] %s14_s7 }
   0x3   :  { %p47_p1 = scmp.lt.u32.totalorder %s43_s10, %s128_s0 }
   0x5   :  { %p49_p2 = pnand %p47_p1, %p44_p0 }
   0x7   :  { %52 = shalt.err (!%p49_p2)
}
   0x8   :  { %s53_s15 = scalar_lea.vmem %s15_s7, 128  ;;  %p58_p4 = scmp.lt.s32.totalorder %s15_s7, %s15_s7 }
   0x9   :  { %p54_p3 = scmp.ne.s32.totalorder %s15_s7, %s53_s15  ;;  %p59_p5 = scmp.lt.s32.totalorder %s53_s15, %s53_s15 }
   0xb   :  { %p60_p6 = por %p59_p5, %p58_p4 }
   0xd   :  { %p61_p7 = pnand %p60_p6, %p54_p3 }
   0xf   :  { %64 = shalt.err (!%p61_p7)
}
  0x10   :  { %17 = dma.hbm_to_vmem [thread:$0]  %s128_s0, 128, %s15_s7, [#allocation3]  }
  0x11   :  { %87 = dma.done.wait [#allocation3], 128  }
  0x12   :  { %88 = vsyncadd [#allocation3], 4294967168  ;;  %v21_v0 = vld [vmem:[#allocation2] sm:$0xff]  ;;  %s92_s18 = smov 1   ;;  %s93_s19 = smov [#allocation5]  }
  0x13   :  { %22 = vrot.lane.b32.xlu0 %v21_v0, %s92_s18  ;;  %s31_s20 = sshll.u32 %s93_s19, 4  ;;  %s32_s20 = int_to_ptr.vmem [resolvable:$true] %s31_s20 }
  0x14   :  { %s65_s21 = scalar_lea.vmem %s32_s20, 128  ;;  %p70_p9 = scmp.lt.s32.totalorder %s32_s20, %s32_s20 }
  0x15   :  { %p66_p8 = scmp.ne.s32.totalorder %s32_s20, %s65_s21  ;;  %p71_p10 = scmp.lt.s32.totalorder %s65_s21, %s65_s21 }
  0x17   :  { %p72_p11 = por %p71_p10, %p70_p9 }
  0x19   :  { %p73_p12 = pnand %p72_p11, %p66_p8 }
  0x85   :  { %v23_v1 = vpop.permute.xlu0 %22 }
  0x86   :  { %24 = vst [vmem:[#allocation5] sm:$0xff] %v23_v1 }
  0x87   :  { %76 = shalt.err (!%p73_p12)
}
  0x88   :  { %s77_s0 = scalar_lea.hbm %s129_s1, 128 }
  0x89   :  { %p78_p13 = scmp.ne.s32.totalorder %s129_s1, %s77_s0  ;;  %p81_p0 = scmp.lt.u32.totalorder %s77_s0, %s129_s1 }
  0x8b   :  { %p83_p1 = pnand %p81_p0, %p78_p13 }
  0x8d   :  { %86 = shalt.err (!%p83_p1)
}
  0x8e   :  { %34 = dma.vmem_to_hbm [thread:$0]  %s32_s20, 128, %s129_s1, [#allocation4]  }
  0x8f   :  { %89 = dma.done.wait [#allocation4], 128  }
  0x90   :  { %90 = vsyncadd [#allocation4], 4294967168 }
  0x91   :  { %38 = vsyncpa [#allocation3], 1 }
  0x92   :  { %39 = vsyncpa [#allocation4], 1 }

</bundles_post_ra>
